<compile_context>
chip_gen: v7x
topology: tpu7x:2x2x1
jax: 0.10.0
libtpu: 0.0.40
codegen_flags: <defaults>
</compile_context>

<pallas_src>
import math
from functools import partial

import jax
import jax.numpy as jnp
from jax.experimental import pallas as pl
from jax.experimental.pallas import tpu as pltpu

d_k = d_v = 32
_SCALE = 1.0 / math.sqrt(d_k)
_LANE = 128


def _sdpa_kernel(q_ref, k_ref, v_ref, mask_ref, ctx_ref, attn_ref, *, fold_scale):
    # Block views (batch dim squeezed by the BlockSpec):
    #   q (TH, TQ, dk)   k (TH, Lk, dk)   v (TH, Lk, dv)
    #   mask (TH|1, TQ|1, Lk|1) int8      ctx (TH, TQ, dv)   attn (TH, TQ, Lk)
    q = q_ref[...]
    k = k_ref[...]
    v = v_ref[...]

    if fold_scale:
        # f32 inputs: fold 1/sqrt(d_k) into Q (Lk/dk x fewer multiplies than
        # scaling the (TQ, Lk) scores; exact enough for f32).
        q = q * jnp.float32(_SCALE)

    # scores[h, q, k] = sum_d q[h, q, d] * k[h, k, d]
    # Batched dot_general contracting on d_k: no K transpose is materialized.
    scores = jax.lax.dot_general(
        q, k,
        dimension_numbers=(((2,), (2,)), ((0,), (0,))),
        preferred_element_type=jnp.float32,
    )
    if not fold_scale:
        # bf16 & friends: scale the f32 scores to avoid extra rounding on Q.
        scores = scores * jnp.float32(_SCALE)

    # masked_fill_(attn_mask, -1e9). The int8 mask block broadcasts over any
    # head / query / key axis it does not carry (no host-side broadcast).
    scores = jnp.where(mask_ref[...] != 0, jnp.float32(-1000000000.0), scores)

    # Numerically stable softmax over keys, in f32.
    # (Fully-masked rows yield a uniform distribution -- same as the reference.)
    smax = jnp.max(scores, axis=-1, keepdims=True)
    p = jnp.exp(scores - smax)
    denom = jnp.sum(p, axis=-1, keepdims=True)
    attn = p * pl.reciprocal(denom, approx=False)

    # context[h, q, d] = sum_k attn[h, q, k] * v[h, k, d]
    # Probabilities cast to V's dtype so bf16 inputs use the fast MXU path.
    ctx = jax.lax.dot_general(
        attn.astype(v.dtype), v,
        dimension_numbers=(((2,), (1,)), ((0,), (0,))),
        preferred_element_type=jnp.float32,
    )

    attn_ref[...] = attn.astype(attn_ref.dtype)
    ctx_ref[...] = ctx.astype(ctx_ref.dtype)


def _round_up(n, m):
    return (n + m - 1) // m * m


def _vmem_budget():
    """Returns (vmem_limit_bytes, per-step target, need >=2 grid steps, TQ cap)."""
    try:
        phys = int(pltpu.get_tpu_info().vmem_capacity_bytes)
    except Exception:
        phys = None
    if phys is None:
        # Unknown chip: conservative (v7x-safe) settings.
        return 32 << 20, 7 << 20, True, 256
    if phys <= (64 << 20):
        # v7x-class: 64 MiB VMEM per TC, 2 TCs -> keep the total grid >= 2 steps.
        return 32 << 20, 7 << 20, True, 256
    # v5e / v6e: 128 MiB VMEM, single TensorCore -> bigger budget, no step floor.
    return 64 << 20, 14 << 20, False, 512


def _q_tile_candidates(Lq, cap):
    """Query-tile candidates (descending preference), all dividing Lq."""
    cands = []
    if Lq <= cap:
        cands.append(Lq)
    # Prefer multiples of 32: lcm of f32 (8) / bf16 (16) / int8 (32) sublanes.
    for tq in range((min(cap, Lq) // 32) * 32, 31, -32):
        if Lq % tq == 0 and tq not in cands:
            cands.append(tq)
    # Fallback: multiples of 8.
    for tq in range((min(cap, Lq) // 8) * 8, 7, -8):
        if Lq % tq == 0 and tq not in cands:
            cands.append(tq)
    if not cands:
        cands.append(Lq)
    return cands


def _per_step_vmem_bytes(TH, TQ, Lk, dk, dv, itemsize, mask_varies):
    """Honest per-grid-step VMEM estimate: 128-lane padding of the dk/dv=32
    blocks, x2 double buffering of every pipelined block, and ~3 live f32
    (TH,TQ,Lk) temporaries inside the body."""
    vh, vq, vk = mask_varies
    dk_l = _round_up(dk, _LANE)
    dv_l = _round_up(dv, _LANE)
    lk_l = _round_up(Lk, _LANE)
    q_b = TH * TQ * dk_l * itemsize
    k_b = TH * Lk * dk_l * itemsize
    v_b = TH * Lk * dv_l * itemsize
    m_b = (TH if vh else 1) * (TQ if vq else 1) * (lk_l if vk else _LANE)  # int8
    c_b = TH * TQ * dv_l * itemsize
    a_b = TH * TQ * lk_l * itemsize
    buffered = 2 * (q_b + k_b + v_b + m_b + c_b + a_b)
    temps = 3 * TH * TQ * lk_l * 4
    return buffered + temps


def _choose_tiles(B, H, Lq, Lk, dk, dv, itemsize, mask_varies,
                  target_bytes, need_multi_step, tq_cap):
    """Pick (TH, TQ): the largest working set under the per-step target; on
    multi-TC chips prefer configurations with >= 2 total grid steps."""
    cands = _q_tile_candidates(Lq, tq_cap)
    h_divs = [th for th in range(H, 0, -1) if H % th == 0]

    best_multi = None   # (bytes, TH, TQ) with >= 2 total grid steps
    best_any = None     # (bytes, TH, TQ) regardless of step count
    for TQ in cands:
        found_any_for_tq = False
        for TH in h_divs:  # descending
            bytes_ = _per_step_vmem_bytes(TH, TQ, Lk, dk, dv, itemsize, mask_varies)
            if bytes_ > target_bytes:
                continue
            steps = B * (H // TH) * (Lq // TQ)
            if not found_any_for_tq:
                found_any_for_tq = True
                if best_any is None or bytes_ > best_any[0]:
                    best_any = (bytes_, TH, TQ)
            if steps >= 2:
                if best_multi is None or bytes_ > best_multi[0]:
                    best_multi = (bytes_, TH, TQ)
                break
            if not need_multi_step:
                break

    if need_multi_step and best_multi is not None:
        chosen = best_multi
    elif best_any is not None:
        chosen = best_any
    else:
        # Nothing fits the target (e.g. huge Lk): minimal configuration.
        chosen = (0, 1, cands[-1])
    return chosen[1], chosen[2]


def scaled_dot_product_attention(Q, K, V, attn_mask):
    """Q:[B,H,Lq,dk]  K:[B,H,Lk,dk]  V:[B,H,Lk,dv]
    attn_mask: bool/int, any shape broadcastable to [B,H,Lq,Lk] with each axis
    either 1 or full-size (True / nonzero => masked with -1e9)."""
    B, H, Lq, dk = Q.shape
    Lk = K.shape[2]
    dv = V.shape[3]

    mB, mH, mLq, mLk = attn_mask.shape
    assert mB in (1, B) and mH in (1, H) and mLq in (1, Lq) and mLk in (1, Lk), (
        "attn_mask must be broadcastable to (B, H, Lq, Lk)")
    # int8 mask in its *natural* shape: no host-side broadcast over heads/queries.
    mask = attn_mask.astype(jnp.int8)

    out_dtype = Q.dtype
    itemsize = jnp.dtype(Q.dtype).itemsize
    fold_scale = (Q.dtype == jnp.float32)

    vmem_limit, target_bytes, need_multi, tq_cap = _vmem_budget()
    mask_varies = (mH == H, mLq == Lq, mLk == Lk)
    TH, TQ = _choose_tiles(B, H, Lq, Lk, dk, dv, itemsize, mask_varies,
                           target_bytes, need_multi, tq_cap)

    grid = (B, H // TH, Lq // TQ)

    th_m = TH if mH == H else 1
    tq_m = TQ if mLq == Lq else 1
    lk_m = Lk if mLk == Lk else 1

    def mask_index(b, h, j):
        return (b if mB == B else 0,
                h if mH == H else 0,
                j if mLq == Lq else 0,
                0)

    # NOTE: attn must be fully materialized ([B,H,Lq,Lk] output), so HBM
    # traffic is O(Lq*Lk) regardless; full-Lk K/V blocks are kept and the
    # tile chooser shrinks TH/TQ instead when Lk is very large.
    ctx, attn = pl.pallas_call(
        partial(_sdpa_kernel, fold_scale=fold_scale),
        out_shape=(
            jax.ShapeDtypeStruct((B, H, Lq, dv), out_dtype),
            jax.ShapeDtypeStruct((B, H, Lq, Lk), out_dtype),
        ),
        grid_spec=pltpu.PrefetchScalarGridSpec(
            num_scalar_prefetch=0,
            grid=grid,
            in_specs=[
                pl.BlockSpec((None, TH, TQ, dk), lambda b, h, j: (b, h, j, 0)),
                # K / V block indices ignore j -> resident across query tiles.
                pl.BlockSpec((None, TH, Lk, dk), lambda b, h, j: (b, h, 0, 0)),
                pl.BlockSpec((None, TH, Lk, dv), lambda b, h, j: (b, h, 0, 0)),
                pl.BlockSpec((None, th_m, tq_m, lk_m), mask_index),
            ],
            out_specs=[
                pl.BlockSpec((None, TH, TQ, dv), lambda b, h, j: (b, h, j, 0)),
                pl.BlockSpec((None, TH, TQ, Lk), lambda b, h, j: (b, h, j, 0)),
            ],
        ),
        compiler_params=pltpu.CompilerParams(
            dimension_semantics=("parallel", "parallel", "parallel"),
            vmem_limit_bytes=vmem_limit,
        ),
    )(Q, K, V, mask)

    return ctx, attn


def _reference(Q, K, V, attn_mask):
    scores = jnp.einsum("bhqd,bhkd->bhqk", Q, K) / math.sqrt(d_k)
    scores = jnp.where(attn_mask, -1000000000.0, scores)
    attn = jax.nn.softmax(scores, axis=-1)
    context = jnp.einsum("bhqk,bhkd->bhqd", attn, V)
    return context, attn


if __name__ == "__main__":
    key = jax.random.PRNGKey(0)
    kq, kk, kv, km = jax.random.split(key, 4)

    B, H, Lq, Lk = 2, 2, 8, 8
    Q = jax.random.normal(kq, (B, H, Lq, d_k), dtype=jnp.float32)
    K = jax.random.normal(kk, (B, H, Lk, d_k), dtype=jnp.float32)
    V = jax.random.normal(kv, (B, H, Lk, d_v), dtype=jnp.float32)

    # Case 1: full per-(b,h,q,k) mask (never masking an entire row).
    full_mask = jax.random.bernoulli(km, 0.25, (B, H, Lq, Lk))
    full_mask = full_mask.at[..., 0].set(False)

    ctx, attn = scaled_dot_product_attention(Q, K, V, full_mask)
    jax.block_until_ready((ctx, attn))
    ref_ctx, ref_attn = _reference(Q, K, V, full_mask)
    assert jnp.allclose(ctx, ref_ctx, atol=1e-4, rtol=1e-4)
    assert jnp.allclose(attn, ref_attn, atol=1e-5, rtol=1e-5)

    # Case 2: key-padding mask in its natural broadcast shape [B,1,1,Lk]
    # (exercises the no-host-broadcast mask path).
    pad_mask = jnp.zeros((B, 1, 1, Lk), dtype=bool).at[:, :, :, Lk - 2:].set(True)
    ctx2, attn2 = scaled_dot_product_attention(Q, K, V, pad_mask)
    jax.block_until_ready((ctx2, attn2))
    ref_ctx2, ref_attn2 = _reference(Q, K, V, pad_mask)
    assert jnp.allclose(ctx2, ref_ctx2, atol=1e-4, rtol=1e-4)
    assert jnp.allclose(attn2, ref_attn2, atol=1e-5, rtol=1e-5)

    print("KERNEL_OK")
</pallas_src>

<mosaic_0001>
module attributes {stable_mosaic.version = 11 : i64} {
  func.func @_sdpa_kernel(%arg0: i32, %arg1: i32, %arg2: i32, %arg3: memref<1x2x8x32xf32, #tpu.memory_space<vmem>>, %arg4: memref<1x2x8x32xf32, #tpu.memory_space<vmem>>, %arg5: memref<1x2x8x32xf32, #tpu.memory_space<vmem>>, %arg6: memref<1x2x8x8xi8, #tpu.memory_space<vmem>>, %arg7: memref<1x2x8x32xf32, #tpu.memory_space<vmem>>, %arg8: memref<1x2x8x8xf32, #tpu.memory_space<vmem>>) attributes {dimension_semantics = [#tpu.dimension_semantics<parallel>, #tpu.dimension_semantics<parallel>, #tpu.dimension_semantics<parallel>], iteration_bounds = array<i64: 2, 1, 1>, scalar_prefetch = 0 : i64, scratch_operands = 0 : i64, tpu.core_type = #tpu.core_type<tc>, window_params = [{transform_indices = @transform_0, window_bounds = array<i64: 1, 2, 8, 32>}, {transform_indices = @transform_1, window_bounds = array<i64: 1, 2, 8, 32>}, {transform_indices = @transform_2, window_bounds = array<i64: 1, 2, 8, 32>}, {transform_indices = @transform_3, window_bounds = array<i64: 1, 2, 8, 8>}, {transform_indices = @transform_4, window_bounds = array<i64: 1, 2, 8, 32>}, {transform_indices = @transform_5, window_bounds = array<i64: 1, 2, 8, 8>}]} {
    %c0 = arith.constant 0 : index
    %c0_0 = arith.constant 0 : index
    %c0_1 = arith.constant 0 : index
    %c0_2 = arith.constant 0 : index
    %0 = vector.load %arg3[%c0, %c0_0, %c0_1, %c0_2] : memref<1x2x8x32xf32, #tpu.memory_space<vmem>>, vector<1x2x8x32xf32>
    %1 = vector.shape_cast %0 : vector<1x2x8x32xf32> to vector<2x8x32xf32>
    %c0_3 = arith.constant 0 : index
    %c0_4 = arith.constant 0 : index
    %c0_5 = arith.constant 0 : index
    %c0_6 = arith.constant 0 : index
    %2 = vector.load %arg4[%c0_3, %c0_4, %c0_5, %c0_6] : memref<1x2x8x32xf32, #tpu.memory_space<vmem>>, vector<1x2x8x32xf32>
    %3 = vector.shape_cast %2 : vector<1x2x8x32xf32> to vector<2x8x32xf32>
    %c0_7 = arith.constant 0 : index
    %c0_8 = arith.constant 0 : index
    %c0_9 = arith.constant 0 : index
    %c0_10 = arith.constant 0 : index
    %4 = vector.load %arg5[%c0_7, %c0_8, %c0_9, %c0_10] : memref<1x2x8x32xf32, #tpu.memory_space<vmem>>, vector<1x2x8x32xf32>
    %5 = vector.shape_cast %4 : vector<1x2x8x32xf32> to vector<2x8x32xf32>
    %cst = arith.constant 0.176776692 : f32
    %6 = vector.broadcast %cst : f32 to vector<2x8x32xf32>
    %7 = arith.mulf %1, %6 : vector<2x8x32xf32>
    %cst_11 = arith.constant dense<0.000000e+00> : vector<2x8x8xf32>
    %8 = tpu.matmul %7, %3, %cst_11 {dimension_numbers = #tpu.dot_dimension_numbers<[2], [2], [1], [1], [0, 0, 0, 1, 1, 1], [0], [0]>} : vector<2x8x32xf32>, vector<2x8x32xf32>, vector<2x8x8xf32> -> vector<2x8x8xf32>
    %c0_12 = arith.constant 0 : index
    %c0_13 = arith.constant 0 : index
    %c0_14 = arith.constant 0 : index
    %c0_15 = arith.constant 0 : index
    %9 = vector.load %arg6[%c0_12, %c0_13, %c0_14, %c0_15] : memref<1x2x8x8xi8, #tpu.memory_space<vmem>>, vector<1x2x8x8xi8>
    %10 = vector.shape_cast %9 : vector<1x2x8x8xi8> to vector<2x8x8xi8>
    %c0_i8 = arith.constant 0 : i8
    %11 = vector.broadcast %c0_i8 : i8 to vector<2x8x8xi8>
    %12 = arith.cmpi ne, %10, %11 : vector<2x8x8xi8>
    %cst_16 = arith.constant -1.000000e+09 : f32
    %13 = vector.broadcast %cst_16 : f32 to vector<2x8x8xf32>
    %14 = arith.select %12, %13, %8 : vector<2x8x8xi1>, vector<2x8x8xf32>
    %cst_17 = arith.constant dense<0xFF800000> : vector<2x8xf32>
    %15 = vector.multi_reduction <maximumf>, %14, %cst_17 [2] : vector<2x8x8xf32> to vector<2x8xf32>
    %16 = vector.shape_cast %15 : vector<2x8xf32> to vector<2x8x1xf32>
    %17 = vector.broadcast %16 : vector<2x8x1xf32> to vector<2x8x8xf32>
    %18 = arith.subf %14, %17 : vector<2x8x8xf32>
    %19 = math.exp %18 : vector<2x8x8xf32>
    %cst_18 = arith.constant dense<0.000000e+00> : vector<2x8xf32>
    %20 = vector.multi_reduction <add>, %19, %cst_18 [2] : vector<2x8x8xf32> to vector<2x8xf32>
    %21 = vector.shape_cast %20 : vector<2x8xf32> to vector<2x8x1xf32>
    %22 = tpu.reciprocal %21 : vector<2x8x1xf32> -> vector<2x8x1xf32>
    %23 = vector.broadcast %22 : vector<2x8x1xf32> to vector<2x8x8xf32>
    %24 = arith.mulf %19, %23 : vector<2x8x8xf32>
    %cst_19 = arith.constant dense<0.000000e+00> : vector<2x8x32xf32>
    %25 = tpu.matmul %24, %5, %cst_19 {dimension_numbers = #tpu.dot_dimension_numbers<[2], [1], [1], [2], [0, 0, 0, 1, 1, 2], [0], [0]>} : vector<2x8x8xf32>, vector<2x8x32xf32>, vector<2x8x32xf32> -> vector<2x8x32xf32>
    %c0_20 = arith.constant 0 : index
    %c0_21 = arith.constant 0 : index
    %c0_22 = arith.constant 0 : index
    %c0_23 = arith.constant 0 : index
    %26 = vector.load %arg8[%c0_20, %c0_21, %c0_22, %c0_23] : memref<1x2x8x8xf32, #tpu.memory_space<vmem>>, vector<1x2x8x8xf32>
    %27 = vector.shape_cast %26 : vector<1x2x8x8xf32> to vector<2x8x8xf32>
    %28 = vector.shape_cast %24 : vector<2x8x8xf32> to vector<1x2x8x8xf32>
    tpu.vector_store %arg8[%c0_20, %c0_21, %c0_22, %c0_23], %28 {strides = array<i32>} : memref<1x2x8x8xf32, #tpu.memory_space<vmem>>, vector<1x2x8x8xf32>,
    %c0_24 = arith.constant 0 : index
    %c0_25 = arith.constant 0 : index
    %c0_26 = arith.constant 0 : index
    %c0_27 = arith.constant 0 : index
    %29 = vector.load %arg7[%c0_24, %c0_25, %c0_26, %c0_27] : memref<1x2x8x32xf32, #tpu.memory_space<vmem>>, vector<1x2x8x32xf32>
    %30 = vector.shape_cast %29 : vector<1x2x8x32xf32> to vector<2x8x32xf32>
    %31 = vector.shape_cast %25 : vector<2x8x32xf32> to vector<1x2x8x32xf32>
    tpu.vector_store %arg7[%c0_24, %c0_25, %c0_26, %c0_27], %31 {strides = array<i32>} : memref<1x2x8x32xf32, #tpu.memory_space<vmem>>, vector<1x2x8x32xf32>,
    return
  }
  func.func @transform_0(%arg0: i32, %arg1: i32, %arg2: i32) -> (i32, i32, i32, i32) {
    %c0_i32 = arith.constant 0 : i32
    %c0_i32_0 = arith.constant 0 : i32
    return %arg0, %arg1, %arg2, %c0_i32 : i32, i32, i32, i32
  }
  func.func @transform_1(%arg0: i32, %arg1: i32, %arg2: i32) -> (i32, i32, i32, i32) {
    %c0_i32 = arith.constant 0 : i32
    %c0_i32_0 = arith.constant 0 : i32
    %c0_i32_1 = arith.constant 0 : i32
    return %arg0, %arg1, %c0_i32, %c0_i32_0 : i32, i32, i32, i32
  }
  func.func @transform_2(%arg0: i32, %arg1: i32, %arg2: i32) -> (i32, i32, i32, i32) {
    %c0_i32 = arith.constant 0 : i32
    %c0_i32_0 = arith.constant 0 : i32
    %c0_i32_1 = arith.constant 0 : i32
    return %arg0, %arg1, %c0_i32, %c0_i32_0 : i32, i32, i32, i32
  }
  func.func @transform_3(%arg0: i32, %arg1: i32, %arg2: i32) -> (i32, i32, i32, i32) {
    %c0_i32 = arith.constant 0 : i32
    %c0_i32_0 = arith.constant 0 : i32
    return %arg0, %arg1, %arg2, %c0_i32 : i32, i32, i32, i32
  }
  func.func @transform_4(%arg0: i32, %arg1: i32, %arg2: i32) -> (i32, i32, i32, i32) {
    %c0_i32 = arith.constant 0 : i32
    %c0_i32_0 = arith.constant 0 : i32
    return %arg0, %arg1, %arg2, %c0_i32 : i32, i32, i32, i32
  }
  func.func @transform_5(%arg0: i32, %arg1: i32, %arg2: i32) -> (i32, i32, i32, i32) {
    %c0_i32 = arith.constant 0 : i32
    %c0_i32_0 = arith.constant 0 : i32
    return %arg0, %arg1, %arg2, %c0_i32 : i32, i32, i32, i32
  }
}

</mosaic_0001>

<bundles_post_ra>
// kernel: tpu_custom_call.1
= control target key start
LH: loop header
LB: loop body
LE: loop exit
PB: predicated region body
PF: predicated region fallthrough
CT: control target
= control target key end

     0   :  { %s1774_s0 = inlined_call_operand.hbm [shape: f32[2,2,8,32], index: 0, kind: input, shape index: {}]   ;;  %s1775_s1 = inlined_call_operand.hbm [shape: f32[2,2,8,32], index: 1, kind: input, shape index: {}]   ;;  %s1776_s2 = inlined_call_operand.hbm [shape: f32[2,2,8,32], index: 2, kind: input, shape index: {}]   ;;  %s1777_s3 = inlined_call_operand.vmem [shape: s8[2,2,8,8], index: 3, kind: input, shape index: {}]   ;;  %s1778_s4 = inlined_call_operand.hbm [shape: f32[2,2,8,32], index: 4, kind: output, shape index: {0}]   ;;  %s1779_s5 = inlined_call_operand.hbm [shape: f32[2,2,8,8], index: 5, kind: output, shape index: {1}]  }
   0x1   :  { %1792 = sst [smem:[#allocation20_spill]] %s1775_s1 }
   0x2   :  { %11 = vsyncpa [#allocation3], 0 }
   0x3   :  { %13 = vsyncpa [#allocation3 + $0x1], 0 }
   0x4   :  { %14 = vsyncpa [#allocation6], 0 }
   0x5   :  { %16 = vsyncpa [#allocation6 + $0x1], 0 }
   0x6   :  { %17 = vsyncpa [#allocation4], 0 }
   0x7   :  { %19 = vsyncpa [#allocation4 + $0x1], 0 }
   0x8   :  { %20 = vsyncpa [#allocation10], 0 }
   0x9   :  { %22 = vsyncpa [#allocation10 + $0x1], 0  ;;  %s1425_s18 = smov 0   ;;  %s1427_s19 = smov 0  }
   0xa   :  { %s1429_s20 = smov 0   ;;  %s1431_s21 = smov 0  }
   0xb   :  { %s1433_s22 = smov 0   ;;  %s1435_s23 = smov 0  }
   0xc LB: > { %1793 = sst [smem:[#allocation15_spill]] %s1377_s22  ;;  %s1456_s24 = sadd.s32 4294967295, %s1381_s23   ;;  %s1381_s23 = sphi %s1435_s23, %s28_s23   ;;  %s1377_s22 = sphi %s1433_s22, %s1820_s22   ;;  %s1373_s21 = sphi %s1431_s21, %s1819_s21   ;;  %s1369_s20 = sphi %s1429_s20, %s1823_s20   ;;  %s1365_s19 = sphi %s1427_s19, %s1822_s19   ;;  %s1361_s18 = sphi %s1425_s18, %s1821_s18  }
   0xd   : > { %1794 = sst [smem:[#allocation16_spill]] %s1381_s23  ;;  %s1013_s25 = sadd.s32 4294967294, %s1381_s23  }
   0xe   : > { %s47_s26 = sadd.s32 1, %s1377_s22  ;;  %s58_s27 = sadd.s32 1, %s1369_s20 }
   0xf   : > { %p49_p0 = scmp.ge.s32.totalorder %s47_s26, 2  ;;  %p65_p1 = scmp.ne.s32.totalorder %s1369_s20, %s1365_s19 }
  0x10   : > { %p66_p2 = scmp.eq.s32.totalorder %s1381_s23, 0  ;;  %p71_p3 = scmp.ne.s32.totalorder %s1365_s19, %s1361_s18 }
  0x11   : > { %s1825_s26 = smov (%p49_p0, %s47_s26), 0  ;;  %p72_p5 = scmp.eq.s32.totalorder %s1456_s24, 0 }
  0x12   : > { %1795 = sst [smem:[#allocation17_spill]] %s1825_s26  ;;  %p1468_p4 = por %p66_p2, %p65_p1 }
  0x13   : > { %s51_s29 = ssub.s32 %s1377_s22, %s1825_s26  ;;  %p185_p6 = scmp.eq.s32.totalorder %s1456_s24, 1 }
  0x14   : > { %p56_p7 = scmp.eq.s32.totalorder %s51_s29, 0  ;;  %p1476_p8 = por %p72_p5, %p71_p3 }
  0x15   : > { %p1480_p9 = por %p185_p6, %p65_p1  ;;  %p191_p10 = scmp.eq.s32.totalorder %s1013_s25, 1 }
  0x16   : > { %s1797_s30 = scalar_select %p1476_p8, 1, 0 }
  0x17   : > { %s1798_s6 = scalar_select %p1480_p9, 1, 0 }
  0x18   : > { %s1485_s7 = scalar_select %p56_p7, %s1369_s20, %s58_s27  }
  0x19   : > { %p1487_p11 = por %p191_p10, %p71_p3  ;;  %p1108_p13 = scmp.lt.s32.totalorder %s1381_s23, 2 }
  0x1a   : > { %1799 = sst [smem:[#allocation18_spill]] %s1485_s7  ;;  %s1780_s9 = sand.u32 1, %s1369_s20  }
  0x1b   : > { %s1800_s8 = scalar_select %p1487_p11, 1, 0 }
  0x1c   : > { %s1496_s10 = sshll.u32 %s1780_s9, 4  ;;  %s1499_s11 = sshll.u32 %s1377_s22, 8 }
  0x1d   : > { %1801 = sst [smem:[#allocation19_spill]] %s1800_s8  ;;  %p1503_p0 = pnand %p1108_p13, %p1468_p4 }
  0x1e   : > { %s265_s13 = sand.u32 1, %s1381_s23   ;;  %s1803_s1 = sld [smem:[#allocation20_spill]] }
  0x1f   : > { %s269_s17 = scalar_lea.vmem [#allocation5], %s1496_s10  ;;  %s1519_s27 = scalar_lea.sflag [#allocation6], %s265_s13 }
  0x20   : > { %s278_s25 = sshll.u32 %s269_s17, 4  ;;  %p1525_p4 = pneg %p1503_p0  ;;  %s1516_s25 = int_to_ptr.vmem [resolvable:$true] %s278_s25 }
  0x24   : > { %s1512_s16 = scalar_lea.hbm %s1803_s1, %s1499_s11  ;;  %s1178_s17 = scalar_lea.hbm %s1803_s1, 512 }
  0x25   : > { %s1173_s28 = scalar_lea.hbm %s1512_s16, 256  ;;  %p1179_p7 = scmp.lt.u32.totalorder %s1512_s16, %s1803_s1 }
  0x26   : > { %p1174_p3 = scmp.ne.s32.totalorder %s1512_s16, %s1173_s28  ;;  %p1180_p10 = scmp.lt.u32.totalorder %s1178_s17, %s1173_s28 }
  0x27   : > { %p1182_p12 = scmp.lt.u32.totalorder %s1173_s28, %s1512_s16 }
  0x28   : > { %p1176_p5 = pnand %p1525_p4, %p1174_p3  ;;  %p1181_p13 = por %p1180_p10, %p1179_p7 }
  0x2a   : > { %p1177_p6 = pneg %p1176_p5  ;;  %p1183_p1 = por %p1182_p12, %p1181_p13 }
  0x2c   : > { %p1184_p2 = pnand %p1183_p1, %p1177_p6 }
  0x2e   : > { %1187 = shalt.err (!%p1184_p2)
}
  0x2f   : > { %s1188_s13 = scalar_lea.vmem %s1516_s25, 256  ;;  %s1383_s14 = smov [#allocation5]  }
  0x30   : > { %p1189_p3 = scmp.ne.s32.totalorder %s1516_s25, %s1188_s13  ;;  %s1193_s15 = sshll.u32 %s1383_s14, 4  ;;  %s1194_s15 = int_to_ptr.vmem [resolvable:$false] %s1193_s15 }
  0x31   : > { %s1195_s26 = scalar_lea.vmem %s1194_s15, 512  ;;  %p1196_p9 = scmp.lt.s32.totalorder %s1516_s25, %s1194_s15 }
  0x32   : > { %p1191_p5 = pnand %p1189_p3, %p1525_p4  ;;  %p1197_p8 = scmp.lt.s32.totalorder %s1195_s26, %s1188_s13 }
  0x34   : > { %p1192_p11 = pneg %p1191_p5  ;;  %p1198_p7 = por %p1197_p8, %p1196_p9 }
  0x36   : > { %p1199_p10 = pnand %p1198_p7, %p1192_p11 }
  0x38   : > { %1202 = shalt.err (!%p1199_p10)
}
  0x39   : > { %s1784_s9 = smov 128   ;;  %s1786_s28 = smov 8  }
  0x3a   : > { %1097 = dma.hbm_to_vmem [thread:$0]  (!%p1503_p0), %s1512_s16, 256, %s1516_s25, %s1519_s27, %s1784_s9, %s1784_s9, %s1786_s28  }
  0x3b   : > { %p1805_p8 = scmp.lt.s32.totalorder %s1381_s23, 3  ;;  %p1806_p9 = scmp.ge.s32.totalorder %s1381_s23, 1 }
  0x3c   : > { %s1564_s15 = scalar_lea.hbm %s1774_s0, %s1499_s11  ;;  %s245_s26 = scalar_lea.vmem [#allocation2], %s1496_s10 }
  0x3d   : > { %p1556_p11 = pnand %p1806_p9, %p1805_p8  ;;  %s255_s1 = sshll.u32 %s245_s26, 4  ;;  %s1567_s1 = int_to_ptr.vmem [resolvable:$true] %s255_s1 }
  0x3e   : > { %s1573_s9 = scalar_lea.hbm %s1776_s2, %s1499_s11  ;;  %s1808_s28 = sand.u32 1, %s1369_s20  }
  0x3f   : > { %s1807_s17 = scalar_select %p1556_p11, 1, 0 }
  0x40   : > { %s1577_s22 = scalar_lea.sflag [#allocation3], %s1808_s28  ;;  %s1203_s7 = scalar_lea.hbm %s1564_s15, 256 }
  0x41   : > { %p1204_p12 = scmp.ne.s32.totalorder %s1564_s15, %s1203_s7  ;;  %s1208_s23 = scalar_lea.hbm %s1774_s0, 512 }
  0x42   : > { %p1209_p6 = scmp.lt.u32.totalorder %s1564_s15, %s1774_s0  ;;  %p1210_p13 = scmp.lt.u32.totalorder %s1208_s23, %s1203_s7 }
  0x43   : > { %p1206_p1 = pnand %p1204_p12, %p1525_p4  ;;  %p1212_p5 = scmp.lt.u32.totalorder %s1203_s7, %s1564_s15 }
  0x44   : > { %p1211_p3 = por %p1210_p13, %p1209_p6 }
  0x45   : > { %p1207_p2 = pneg %p1206_p1 }
  0x46   : > { %p1213_p7 = por %p1212_p5, %p1211_p3 }
  0x48   : > { %p1214_p10 = pnand %p1213_p7, %p1207_p2 }
  0x4a   : > { %1217 = shalt.err (!%p1214_p10)
}
  0x4b   : > { %s1218_s11 = scalar_lea.vmem %s1567_s1, 256  ;;  %s1386_s28 = smov [#allocation2]  }
  0x4c   : > { %p1219_p8 = scmp.ne.s32.totalorder %s1567_s1, %s1218_s11  ;;  %s1223_s16 = sshll.u32 %s1386_s28, 4  ;;  %s1224_s16 = int_to_ptr.vmem [resolvable:$false] %s1223_s16 }
  0x4d   : > { %s1225_s8 = scalar_lea.vmem %s1224_s16, 512  ;;  %p1226_p1 = scmp.lt.s32.totalorder %s1567_s1, %s1224_s16 }
  0x4e   : > { %p1221_p9 = pnand %p1219_p8, %p1525_p4  ;;  %p1227_p11 = scmp.lt.s32.totalorder %s1225_s8, %s1218_s11 }
  0x50   : > { %p1222_p12 = pneg %p1221_p9  ;;  %p1228_p6 = por %p1227_p11, %p1226_p1 }
  0x52   : > { %p1229_p13 = pnand %p1228_p6, %p1222_p12 }
  0x54   : > { %1232 = shalt.err (!%p1229_p13)
}
  0x55   : > { %s1809_s23 = smov 8   ;;  %s1810_s7 = smov 128  }
  0x56   : > { %1094 = dma.hbm_to_vmem [thread:$0]  (!%p1503_p0), %s1564_s15, 256, %s1567_s1, %s1577_s22, %s1810_s7, %s1810_s7, %s1809_s23  }
  0x57   : > { %s292_s25 = scalar_lea.vmem [#allocation7], %s1496_s10  ;;  %s1233_s14 = scalar_lea.hbm %s1573_s9, 256 }
  0x58   : > { %s301_s13 = sshll.u32 %s292_s25, 4  ;;  %p1234_p11 = scmp.ne.s32.totalorder %s1573_s9, %s1233_s14  ;;  %s1605_s13 = int_to_ptr.vmem [resolvable:$true] %s301_s13 }
  0x59   : > { %s1238_s28 = scalar_lea.hbm %s1776_s2, 512  ;;  %p1239_p5 = scmp.lt.u32.totalorder %s1573_s9, %s1776_s2 }
  0x5a   : > { %p1236_p2 = pnand %p1234_p11, %p1525_p4  ;;  %p1240_p7 = scmp.lt.u32.totalorder %s1238_s28, %s1233_s14 }
  0x5b   : > { %p1242_p8 = scmp.lt.u32.totalorder %s1233_s14, %s1573_s9 }
  0x5c   : > { %p1237_p3 = pneg %p1236_p2  ;;  %p1241_p10 = por %p1240_p7, %p1239_p5 }
  0x5e   : > { %p1243_p9 = por %p1242_p8, %p1241_p10 }
  0x60   : > { %p1244_p12 = pnand %p1243_p9, %p1237_p3 }
  0x62   : > { %1247 = shalt.err (!%p1244_p12)
}
  0x63   : > { %s1248_s1 = scalar_lea.vmem %s1605_s13, 256  ;;  %s1387_s22 = smov [#allocation7]  }
  0x64   : > { %p1249_p1 = scmp.ne.s32.totalorder %s1605_s13, %s1248_s1  ;;  %s1253_s10 = sshll.u32 %s1387_s22, 4  ;;  %s1254_s10 = int_to_ptr.vmem [resolvable:$false] %s1253_s10 }
  0x65   : > { %s1255_s15 = scalar_lea.vmem %s1254_s10, 512  ;;  %p1256_p11 = scmp.lt.s32.totalorder %s1605_s13, %s1254_s10 }
  0x66   : > { %p1251_p6 = pnand %p1249_p1, %p1525_p4  ;;  %p1257_p2 = scmp.lt.s32.totalorder %s1255_s15, %s1248_s1 }
  0x68   : > { %p1252_p13 = pneg %p1251_p6  ;;  %p1258_p5 = por %p1257_p2, %p1256_p11 }
  0x6a   : > { %p1259_p7 = pnand %p1258_p5, %p1252_p13 }
  0x6c   : > { %1262 = shalt.err (!%p1259_p7)
}
  0x6d   : > { %1100 = dma.hbm_to_vmem [thread:$0]  (!%p1503_p0), %s1573_s9, 256, %s1605_s13, %s1519_s27, %s1810_s7, %s1810_s7, %s1809_s23  }
  0x6e   : > { %p1811_p4 = scmp.ne.s32.totalorder %s1807_s17, 0 }
  0x6f   : > { %s1635_s29 = sand.u32 (!%p1811_p4), 1, %s1365_s19   ;;  %p1812_p3 = scmp.ne.s32.totalorder (!%p1811_p4), %s1797_s30, 0 }
  0x70   : > { %329 = sbr.rel (%p1811_p4) target bundleno = 886 (0x376), region = 36  ;;  %s1638_s25 = sshll.u32 (!%p1811_p4), %s1635_s29, 4 }
  0x71   : > { %s332_s12 = scalar_lea.sflag (!%p1811_p4), [#allocation3], %s1635_s29  ;;  %s335_s14 = scalar_lea.vmem (!%p1811_p4), [#allocation2], %s1638_s25 }
  0x77   : > { %1344 = dma.done.wait (%p1812_p3), %s332_s12, 256  }
  0x78   : > { %1346 = vsyncadd (%p1812_p3), %s332_s12, 4294967040  ;;  %s340_s27 = sand.u32 1, %s1456_s24   ;;  %s344_s17 = scalar_lea.vmem [#allocation5], %s1638_s25 }
  0x79   : > { %s341_s9 = scalar_lea.sflag [#allocation6], %s340_s27 }
  0x7a   : > { %1348 = dma.done.wait (%p1812_p3), %s341_s9, 512  }
  0x7b   : > { %1350 = vsyncadd (%p1812_p3), %s341_s9, 4294966784  ;;  %v1388_v0 = vmov 0.0   ;;  %vm1389_vm0 = vmmov 0   ;;  %vm435_vm1 = vcmask 261120   ;;  %v429_v1 = vld [vmem:[%s344_s17] sm:$0xff]  ;;  %v430_v3 = vld [vmem:[%s344_s17 + $0x8] sm:$0xff] }
  0x7c   : > { %1061 = vmatprep.subr.mxu0 %v1388_v0  ;;  %1063 = vmatprep.mubr.msk.f32.mxu0 %vm1389_vm0, %v1388_v0  ;;  %v427_v2 = vld [vmem:[%s335_s14] sm:$0xff]  ;;  %v428_v5 = vld [vmem:[%s335_s14 + $0x8] sm:$0xff]  ;;  %p411_p0 = scmp.lt.s32.totalorder %s1373_s21, 1  ;;  %v1390_v9 = vmov 0   ;;  %vm600_vm6 = vcmask 64512   ;;  %s353_s26 = scalar_lea.vmem [#allocation7], %s1638_s25 }
  0x7d   : > { %1066 = vmatprep.subr.mxu1 %v1388_v0  ;;  %1068 = vmatprep.mubr.msk.f32.mxu1 %vm1389_vm0, %v1388_v0  ;;  %v433_v4 = vmul.f32 0.17677669, %v427_v2  ;;  %v434_v6 = vmul.f32 0.17677669, %v428_v5  ;;  %v431_v32 = vld [vmem:[%s353_s26] sm:$0xff]  ;;  %v432_v33 = vld [vmem:[%s353_s26 + $0x8] sm:$0xff] }
  0x7e   : > { %1062 = vmatpush3.xpose.msk.msra.mxu0 %vm435_vm1, %v429_v1  ;;  %1067 = vmatpush3.xpose.msk.msra.mxu1 %vm435_vm1, %v430_v3  ;;  %s412_s24 = scalar_select %p411_p0, %s1373_s21, 1 }
  0x7f   : > { %1071 = vmatprep.subr.mxu0 %v1388_v0  ;;  %1076 = vmatprep.subr.mxu1 %v1388_v0  ;;  %s406_s11 = scalar_lea.vmem [#allocation9], %s1638_s25  ;;  %s1051_s28 = sshll.u32 %s1373_s21, 8 }
  0x80   : > { %s1050_s30 = sshll.u32 %s412_s24, 2  ;;  %s814_s16 = sshll.u32 %s406_s11, 4  ;;  %s1683_s16 = int_to_ptr.vmem [resolvable:$true] %s814_s16 }
  0x81   : > { %1064 = vmatmul.mubr.msk.f32.vlgmr.msra.gmra.mrb[0].mxu0 %vm435_vm1, %v433_v4  ;;  %1069 = vmatmul.mubr.msk.f32.vlgmr.msra.gmra.mrb[0].mxu1 %vm435_vm1, %v434_v6  ;;  %s421_s13 = scalar_lea.vmem %s1777_s3, %s1050_s30  ;;  %s1681_s22 = scalar_lea.hbm %s1779_s5, %s1051_s28 }
  0x82   : > { %1073 = vmatprep.mubr.msk.f32.mxu0 %vm1389_vm0, %v1388_v0  ;;  %1078 = vmatprep.mubr.msk.f32.mxu1 %vm1389_vm0, %v1388_v0  ;;  %v588_v7 = vld [vmem:[%s421_s13] sm:$0x3]  ;;  %v589_v8 = vld [vmem:[%s421_s13 + $0x2] sm:$0x3]  ;;  %s779_s10 = scalar_lea.sflag [#allocation10], %s1635_s29  ;;  %s1263_s15 = scalar_lea.vmem %s1683_s16, 256 }
  0x83   : > { %vm590_vm2 = vnez %v588_v7  ;;  %vm591_vm3 = vnez %v589_v8  ;;  %1072 = vmatpush3.msra.mxu0 %v431_v32  ;;  %1077 = vmatpush3.msra.mxu1 %v432_v33  ;;  %p1264_p10 = scmp.ne.s32.totalorder %s1683_s16, %s1263_s15  ;;  %p1813_p8 = scmp.ne.s32.totalorder %s1798_s6, 0 }
  0x84   : > { %v592_v10 = vsel %vm590_vm2, 16843009, %v1390_v9  ;;  %v593_v11 = vsel %vm591_vm3, 16843009, %v1390_v9  ;;  %s1391_s12 = smov [#allocation9]  }
  0x85   : > { %v594_v12 = vunpack.c.0.s8 %v592_v10  ;;  %v595_v13 = vunpack.c.0.s8 %v593_v11  ;;  %p1265_p9 = pnand %p1264_p10, %p1813_p8  ;;  %s1267_s14 = sshll.u32 %s1391_s12, 4  ;;  %s1268_s14 = int_to_ptr.vmem [resolvable:$false] %s1267_s14 }
  0x86   : > { %s1269_s27 = scalar_lea.vmem %s1268_s14, 512  ;;  %p1270_p1 = scmp.lt.s32.totalorder %s1683_s16, %s1268_s14 }
  0x87   : > { %vm596_vm4 = vcmp.ne.s32.totalorder %v594_v12, 0  ;;  %vm597_vm5 = vcmp.ne.s32.totalorder %v595_v13, 0  ;;  %p1266_p12 = pneg %p1265_p9  ;;  %p1271_p6 = scmp.lt.s32.totalorder %s1269_s27, %s1263_s15 }
  0x89   : > { %p1272_p13 = por %p1271_p6, %p1270_p1 }
  0x8b   : > { %p1273_p11 = pnand %p1272_p13, %p1266_p12 }
 0x154   : > { %v508_v14 = vpop.f32.mrb[0].mxu0  ;;  %v584_v15 = vpop.f32.mrb[0].mxu1 }
 0x155   : > { %v598_v16 = vsel %vm596_vm4, -1e+09, %v508_v14  ;;  %v1065_v17 = vpop.f32.mrb[1].mxu0  ;;  %v599_v18 = vsel %vm597_vm5, -1e+09, %v584_v15  ;;  %v1070_v19 = vpop.f32.mrb[1].mxu1 }
 0x156   : > { %v601_v20 = vsel %vm600_vm6, %v598_v16, -inf  ;;  %v604_v21 = vsel %vm600_vm6, %v599_v18, -inf }
 0x157   : > { %602 = vmax.xlane.f32.xlu0 %v601_v20 }
 0x15b   : > { %605 = vmax.xlane.f32.xlu0 %v604_v21 }
 0x1e4   : > { %v603_v22 = vpop.xlane.xlu0 %602 }
 0x1e5   : > { %v607_v23 = vsub.f32 %v598_v16, %v603_v22 }
 0x1e7   : > { %v609_v24 = vmul.f32 1.442695, %v607_v23 }
 0x1e8   : > { %v606_v25 = vpop.xlane.xlu0 %605 }
 0x1e9   : > { %1165 = vpow2.f32 %v609_v24  ;;  %v608_v26 = vsub.f32 %v599_v18, %v606_v25 }
 0x1eb   : > { %v611_v27 = vmul.f32 1.442695, %v608_v26 }
 0x1ed   : > { %1167 = vpow2.f32 %v611_v27 }
 0x1f3   : > { %v1166_v28 = vpop.eup %1165 }
 0x1f4   : > { %v613_v29 = vsel %vm600_vm6, %v1166_v28, 0.0 }
 0x1f5   : > { %614 = vadd.xlane.f32.xlu1 %v613_v29 }
 0x1f7   : > { %v1168_v30 = vpop.eup %1167 }
 0x1f8   : > { %v616_v31 = vsel %vm600_vm6, %v1168_v30, 0.0 }
 0x1f9   : > { %617 = vadd.xlane.f32.xlu1 %v616_v31 }
 0x282   : > { %v615_v34 = vpop.xlane.xlu1 %614 }
 0x283   : > { %1169 = vrcp.f32 %v615_v34 }
 0x286   : > { %v618_v35 = vpop.xlane.xlu1 %617 }
 0x287   : > { %1171 = vrcp.f32 %v618_v35 }
 0x28d   : > { %v1170_v36 = vpop.eup %1169 }
 0x28e   : > { %v621_v37 = vmul.f32 %v1170_v36, %v1166_v28 }
 0x290   : > { %1074 = vmatmul.mubr.msk.f32.vlgmr.msra.gmra.mrb[2].mxu0 %vm600_vm6, %v621_v37  ;;  %769 = vst.msk [vmem:[%s406_s11] sm:$0xff] %vm600_vm6, %v621_v37 }
 0x291   : > { %v1172_v38 = vpop.eup %1171 }
 0x292   : > { %v622_v39 = vmul.f32 %v1172_v38, %v1168_v30 }
 0x294   : > { %1079 = vmatmul.mubr.msk.f32.vlgmr.msra.gmra.mrb[2].mxu1 %vm600_vm6, %v622_v39  ;;  %770 = vst.msk [vmem:[%s406_s11 + $0x8] sm:$0xff] %vm600_vm6, %v622_v39 }
 0x295   : > { %1276 = shalt.err (!%p1273_p11)
}
 0x296   : > { %s1277_s9 = scalar_lea.hbm %s1681_s22, 256  ;;  %s1281_s30 = scalar_lea.hbm %s1779_s5, 512 }
 0x297   : > { %p1278_p2 = scmp.ne.s32.totalorder %s1681_s22, %s1277_s9  ;;  %p1282_p4 = scmp.lt.u32.totalorder %s1681_s22, %s1779_s5 }
 0x298   : > { %p1283_p3 = scmp.lt.u32.totalorder %s1281_s30, %s1277_s9  ;;  %p1285_p10 = scmp.lt.u32.totalorder %s1277_s9, %s1681_s22 }
 0x299   : > { %p1279_p5 = pnand %p1278_p2, %p1813_p8 }
 0x29a   : > { %p1284_p0 = por %p1283_p3, %p1282_p4 }
 0x29b   : > { %p1280_p7 = pneg %p1279_p5 }
 0x29c   : > { %p1286_p9 = por %p1285_p10, %p1284_p0 }
 0x29e   : > { %p1287_p12 = pnand %p1286_p9, %p1280_p7 }
 0x2a0   : > { %1290 = shalt.err (!%p1287_p12)
}
 0x2a1   : > { %s1392_s13 = smov 128   ;;  %s1393_s26 = smov 8  }
 0x2a2   : > { %1088 = dma.vmem_to_hbm [thread:$0]  (%p1813_p8), %s1683_s16, 256, %s1681_s22, %s779_s10, %s1392_s13, %s1392_s13, %s1393_s26  }
 0x2a3   : > { %s399_s11 = scalar_lea.vmem [#allocation8], %s1638_s25  ;;  %s1721_s12 = scalar_lea.hbm %s1778_s4, %s1051_s28 }
 0x2a4   : > { %s795_s8 = sshll.u32 %s399_s11, 4  ;;  %s774_s25 = scalar_lea.sflag [#allocation4], %s1635_s29  ;;  %s1714_s8 = int_to_ptr.vmem [resolvable:$true] %s795_s8 }
 0x2a5   : > { %s1291_s16 = scalar_lea.vmem %s1714_s8, 256  ;;  %s1394_s22 = smov [#allocation8]  }
 0x2a6   : > { %p1292_p1 = scmp.ne.s32.totalorder %s1714_s8, %s1291_s16  ;;  %s1295_s21 = sshll.u32 %s1394_s22, 4  ;;  %s1296_s21 = int_to_ptr.vmem [resolvable:$false] %s1295_s21 }
 0x2a7   : > { %s1297_s10 = scalar_lea.vmem %s1296_s21, 512  ;;  %p1298_p11 = scmp.lt.s32.totalorder %s1714_s8, %s1296_s21 }
 0x2a8   : > { %p1293_p6 = pnand %p1292_p1, %p1813_p8  ;;  %p1299_p2 = scmp.lt.s32.totalorder %s1297_s10, %s1291_s16 }
 0x2aa   : > { %p1294_p13 = pneg %p1293_p6  ;;  %p1300_p5 = por %p1299_p2, %p1298_p11 }
 0x2ac   : > { %p1301_p7 = pnand %p1300_p5, %p1294_p13 }
 0x363   : > { %v692_v40 = vpop.f32.mrb[2].mxu0 }
 0x364   : > { %771 = vst.msk [vmem:[%s399_s11] sm:$0xff] %vm435_vm1, %v692_v40  ;;  %v1075_v41 = vpop.f32.mrb[3].mxu0 }
 0x367   : > { %v765_v42 = vpop.f32.mrb[2].mxu1 }
 0x368   : > { %772 = vst.msk [vmem:[%s399_s11 + $0x8] sm:$0xff] %vm435_vm1, %v765_v42  ;;  %v1080_v43 = vpop.f32.mrb[3].mxu1 }
 0x369   : > { %1304 = shalt.err (!%p1301_p7)
}
 0x36a   : > { %s1305_s28 = scalar_lea.hbm %s1721_s12, 256  ;;  %s1309_s9 = scalar_lea.hbm %s1778_s4, 512 }
 0x36b   : > { %p1306_p4 = scmp.ne.s32.totalorder %s1721_s12, %s1305_s28  ;;  %p1310_p10 = scmp.lt.u32.totalorder %s1721_s12, %s1778_s4 }
 0x36c   : > { %p1311_p9 = scmp.lt.u32.totalorder %s1309_s9, %s1305_s28  ;;  %p1313_p1 = scmp.lt.u32.totalorder %s1305_s28, %s1721_s12 }
 0x36d   : > { %p1307_p3 = pnand %p1306_p4, %p1813_p8 }
 0x36e   : > { %p1312_p12 = por %p1311_p9, %p1310_p10 }
 0x36f   : > { %p1308_p0 = pneg %p1307_p3 }
 0x370   : > { %p1314_p6 = por %p1313_p1, %p1312_p12 }
 0x372   : > { %p1315_p13 = pnand %p1314_p6, %p1308_p0 }
 0x374   : > { %1318 = shalt.err (!%p1315_p13)
}
 0x375   : > { %1087 = dma.vmem_to_hbm [thread:$0]  (%p1813_p8), %s1714_s8, 256, %s1721_s12, %s774_s25, %s1392_s13, %s1392_s13, %s1393_s26  }
 0x376 PF: > { %s1814_s30 = sld [smem:[#allocation19_spill]]  ;;  %s1815_s23 = sld [smem:[#allocation16_spill]] }
 0x377   : > { %s829_s7 = sand.u32 1, %s1361_s18  }
 0x378   : > { %s830_s11 = scalar_lea.sflag [#allocation4], %s829_s7 }
 0x37c   : > { %p1816_p11 = scmp.ne.s32.totalorder %s1814_s30, 0  ;;  %p1817_p2 = scmp.ge.s32.totalorder %s1815_s23, 2 }
 0x37e   : > { %p1102_p5 = pnand %p1817_p2, %p1816_p11 }
 0x380   : > { %1352 = dma.done.wait (!%p1102_p5), %s830_s11, 256  }
 0x381   : > { %1354 = vsyncadd (!%p1102_p5), %s830_s11, 4294967040  ;;  %s839_s6 = scalar_lea.sflag [#allocation10], %s829_s7 }
 0x382   : > { %1356 = dma.done.wait (!%p1102_p5), %s839_s6, 256  }
 0x383   : > { %1358 = vsyncadd (!%p1102_p5), %s839_s6, 4294967040  ;;  %s28_s23 = sadd.s32 1, %s1815_s23   ;;  %s1818_s29 = sld [smem:[#allocation18_spill]] }
 0x384   : > { %p25_p7 = scmp.ge.s32.totalorder %s28_s23, 4   ;;  %s1819_s21 = sld [smem:[#allocation15_spill]] }
 0x385   : > { %s1820_s22 = sld [smem:[#allocation17_spill]]  ;;  %s1821_s18 = smov %s1365_s19 }
 0x386   : > { %s1822_s19 = smov %s1369_s20  ;;  %27 = sbr.rel (!%p25_p7) target bundleno = 12 (0xc), region = 125 }
 0x389   : > { %s1823_s20 = smov %s1818_s29 }
 0x38d   :  { %844 = vsyncpa [#allocation3], 1 }
 0x38e   :  { %846 = vsyncpa [#allocation3 + $0x1], 1 }
 0x38f   :  { %847 = vsyncpa [#allocation6], 1 }
 0x390   :  { %849 = vsyncpa [#allocation6 + $0x1], 1 }
 0x391   :  { %850 = vsyncpa [#allocation4], 1 }
 0x392   :  { %852 = vsyncpa [#allocation4 + $0x1], 1 }
 0x393   :  { %853 = vsyncpa [#allocation10], 1 }
 0x394   :  { %855 = vsyncpa [#allocation10 + $0x1], 1 }

</bundles_post_ra>
